<compile_context>
chip_gen: v5e
topology: v5e:2x2
jax: 0.10.0
libtpu: 0.0.40
codegen_flags: <defaults>
</compile_context>

<pallas_src>
from functools import partial

import jax
import jax.numpy as jnp
from jax.experimental import pallas as pl
from jax.experimental.pallas import tpu as pltpu


def _round_up(x, m):
    return (x + m - 1) // m * m


def _cdiv(a, b):
    return -(-a // b)


def _detect_num_tensorcores():
    """Best-effort TensorCore-per-chip count (2 on v7x, 1 on v5e/v6e)."""
    try:
        info = pltpu.get_tpu_info()
        for attr in ("tensorcores_per_chip", "num_tensorcores", "num_cores",
                     "cores_per_chip"):
            v = getattr(info, attr, None)
            if isinstance(v, int) and v > 0:
                return min(int(v), 2)
    except Exception:
        pass
    return 1


def _layout(state_size, fc1_units, fc2_units, action_size):
    """Row/column layout of the single packed parameter buffer.

    The buffer is `width` lanes wide (width = max layer size rounded up to
    128).  Every weight segment spans the FULL width in both rows (for w2/w3,
    matching the full-width hidden activations) and columns, so the kernel can
    read full-lane slabs with no masked loads.  All segment starts are 8-row
    aligned.  Padding is zeros, which keeps the math exact.
    """
    s_pad = _round_up(state_size, 8)
    width = _round_up(max(fc1_units, fc2_units, action_size), 128)

    r_w1 = 0
    r_b1 = r_w1 + s_pad
    r_w2 = r_b1 + 8
    r_b2 = r_w2 + width
    r_w3 = r_b2 + 8
    r_b3 = r_w3 + width
    rows = r_b3 + 8
    return dict(s_pad=s_pad, width=width, rows=rows,
                r_w1=r_w1, r_b1=r_b1, r_w2=r_w2, r_b2=r_b2,
                r_w3=r_w3, r_b3=r_b3)


def pack_qnetwork_params(w1, b1, w2, b2, w3, b3, dtype=jnp.float32):
    """Pack all parameters into one lane-dense 2D buffer (build once, reuse).

    Weights are (in_features, out_features), i.e. the TRANSPOSE of PyTorch's
    nn.Linear weight layout; biases are 1-D (out_features,).
    Use dtype=jnp.bfloat16 to enable the bf16 MXU path (f32 accumulation).
    """
    state_size, fc1_units = w1.shape
    assert w2.shape[0] == fc1_units, (w1.shape, w2.shape)
    fc2_units = w2.shape[1]
    assert w3.shape[0] == fc2_units, (w2.shape, w3.shape)
    action_size = w3.shape[1]
    assert b1.size == fc1_units and b2.size == fc2_units and b3.size == action_size

    L = _layout(state_size, fc1_units, fc2_units, action_size)
    p = jnp.zeros((L["rows"], L["width"]), dtype)
    p = p.at[L["r_w1"]:L["r_w1"] + state_size, :fc1_units].set(w1.astype(dtype))
    p = p.at[L["r_b1"], :fc1_units].set(jnp.reshape(b1, (-1,)).astype(dtype))
    p = p.at[L["r_w2"]:L["r_w2"] + fc1_units, :fc2_units].set(w2.astype(dtype))
    p = p.at[L["r_b2"], :fc2_units].set(jnp.reshape(b2, (-1,)).astype(dtype))
    p = p.at[L["r_w3"]:L["r_w3"] + fc2_units, :action_size].set(w3.astype(dtype))
    p = p.at[L["r_b3"], :action_size].set(jnp.reshape(b3, (-1,)).astype(dtype))
    return p


def _make_kernel(L):
    s_pad, width = L["s_pad"], L["width"]
    r_w1, r_b1 = L["r_w1"], L["r_b1"]
    r_w2, r_b2 = L["r_w2"], L["r_b2"]
    r_w3, r_b3 = L["r_w3"], L["r_b3"]

    def kernel(x_ref, p_ref, o_ref):
        wdt = p_ref.dtype                                  # f32 or bf16 knob
        x = x_ref[...].astype(wdt)                         # (tb, s_pad)

        # fc1 + ReLU -- full-width (lane-dense) weight/bias slabs; zero-padded
        # columns produce exactly 0 after relu, so downstream math is exact.
        w1 = p_ref[r_w1:r_w1 + s_pad, :]                   # (s_pad, width)
        b1 = p_ref[r_b1:r_b1 + 1, :].astype(jnp.float32)   # (1, width)
        h1 = jnp.maximum(
            jnp.dot(x, w1, preferred_element_type=jnp.float32) + b1, 0.0)

        # fc2 + ReLU
        w2 = p_ref[r_w2:r_w2 + width, :]                   # (width, width)
        b2 = p_ref[r_b2:r_b2 + 1, :].astype(jnp.float32)
        h2 = jnp.maximum(
            jnp.dot(h1.astype(wdt), w2, preferred_element_type=jnp.float32) + b2,
            0.0)

        # fc3 (no activation); output columns are lane-dense (width = k*128),
        # padded columns compute to exactly 0 and are sliced off outside.
        w3 = p_ref[r_w3:r_w3 + width, :]                   # (width, width)
        b3 = p_ref[r_b3:r_b3 + 1, :].astype(jnp.float32)
        o_ref[...] = (
            jnp.dot(h2.astype(wdt), w3, preferred_element_type=jnp.float32) + b3
        ).astype(o_ref.dtype)

    return kernel


@partial(jax.jit, static_argnames=("state_size", "fc1_units", "fc2_units",
                                   "action_size", "block_batch", "num_cores"))
def qnetwork_forward_packed(x, params, *, state_size, fc1_units, fc2_units,
                            action_size, block_batch=1024, num_cores=1):
    """Fused 3-layer MLP on a packed parameter buffer.

    Tiling policy (generation-aware):
      * num_cores == 1 (v5e/v6e): a single grid step covering the whole batch,
        capped at `block_batch` rows per step for very large batches.
      * num_cores == 2 (v7x): exactly two parallel grid steps when the batch is
        big enough, so both TensorCores are busy with no extra step overhead.
    """
    L = _layout(state_size, fc1_units, fc2_units, action_size)
    batch = x.shape[0]

    bb = _round_up(max(block_batch, 8), 8)
    if num_cores > 1 and batch > 8:
        tb = _round_up(_cdiv(batch, num_cores), 8)
    else:
        tb = _round_up(max(batch, 1), 8)
    tb = min(tb, bb)
    num_blocks = _cdiv(batch, tb)
    b_pad = num_blocks * tb

    # Single pad op (rows to the tile, cols to the sublane boundary); fuses
    # into this one jitted dispatch.  Zero padding is exact.
    x_p = jnp.pad(x.astype(params.dtype),
                  ((0, b_pad - batch), (0, L["s_pad"] - state_size)))

    kernel = _make_kernel(L)

    out_padded = pl.pallas_call(
        kernel,
        out_shape=jax.ShapeDtypeStruct((b_pad, L["width"]), jnp.float32),
        grid=(num_blocks,),
        in_specs=[
            # batch tile of states
            pl.BlockSpec((tb, L["s_pad"]), lambda i: (i, 0)),
            # single packed parameter block; same block every grid step, so it
            # is not re-fetched per batch tile.
            pl.BlockSpec((L["rows"], L["width"]), lambda i: (0, 0)),
        ],
        out_specs=pl.BlockSpec((tb, L["width"]), lambda i: (i, 0)),
        compiler_params=pltpu.CompilerParams(
            dimension_semantics=("parallel",)),
    )(x_p, params)

    return out_padded[:batch, :action_size]


def qnetwork_forward(x, w1, b1, w2, b2, w3, b3, num_cores=1):
    """Convenience wrapper: pack params then run (prefer caching the packed params)."""
    params = pack_qnetwork_params(w1, b1, w2, b2, w3, b3)
    return qnetwork_forward_packed(
        x, params,
        state_size=w1.shape[0], fc1_units=w1.shape[1],
        fc2_units=w2.shape[1], action_size=w3.shape[1],
        num_cores=num_cores)


def init_linear_params(key, in_features, out_features):
    """Deterministic init mimicking nn.Linear's default U(-1/sqrt(in), 1/sqrt(in)).

    Weight is returned already transposed to (in_features, out_features),
    bias as (out_features,).
    """
    kw, kb = jax.random.split(key)
    bound = 1.0 / jnp.sqrt(jnp.float32(in_features))
    w = jax.random.uniform(
        kw, (in_features, out_features), jnp.float32, minval=-bound, maxval=bound)
    b = jax.random.uniform(
        kb, (out_features,), jnp.float32, minval=-bound, maxval=bound)
    return w, b


def qnetwork_reference(x, w1, b1, w2, b2, w3, b3):
    h1 = jnp.maximum(x @ w1 + b1, 0.0)
    h2 = jnp.maximum(h1 @ w2 + b2, 0.0)
    return h2 @ w3 + b3


if __name__ == "__main__":
    # CartPole-like sizes: state_size=4, action_size=2, fc1=fc2=64, batch=8.
    batch = 8
    state_size = 4
    action_size = 2
    fc1_units = 64
    fc2_units = 64

    num_cores = _detect_num_tensorcores()

    key = jax.random.PRNGKey(0)
    kx, k1, k2, k3, kx2 = jax.random.split(key, 5)

    x = jax.random.normal(kx, (batch, state_size), jnp.float32)
    w1, b1 = init_linear_params(k1, state_size, fc1_units)
    w2, b2 = init_linear_params(k2, fc1_units, fc2_units)
    w3, b3 = init_linear_params(k3, fc2_units, action_size)

    # Pack parameters once; reuse across calls (DQN inner loop).
    params = pack_qnetwork_params(w1, b1, w2, b2, w3, b3)

    out = qnetwork_forward_packed(
        x, params, state_size=state_size, fc1_units=fc1_units,
        fc2_units=fc2_units, action_size=action_size, num_cores=num_cores)
    out = jax.block_until_ready(out)

    ref = qnetwork_reference(x, w1, b1, w2, b2, w3, b3)
    assert out.shape == (batch, action_size), out.shape
    assert jnp.allclose(out, ref, atol=1e-4, rtol=1e-4), (out, ref)

    # Larger, non-multiple-of-8 batch: single grid step (or 2 on dual-TC chips).
    x_big = jax.random.normal(kx2, (300, state_size), jnp.float32)
    out_big = jax.block_until_ready(
        qnetwork_forward_packed(
            x_big, params, state_size=state_size, fc1_units=fc1_units,
            fc2_units=fc2_units, action_size=action_size, num_cores=num_cores))
    ref_big = qnetwork_reference(x_big, w1, b1, w2, b2, w3, b3)
    assert out_big.shape == (300, action_size), out_big.shape
    assert jnp.allclose(out_big, ref_big, atol=1e-4, rtol=1e-4)

    # Force the multi-step tiled path (block_batch=128 -> 3 grid steps) to
    # exercise the grid/padding logic for very large offline batches.
    out_tiled = jax.block_until_ready(
        qnetwork_forward_packed(
            x_big, params, state_size=state_size, fc1_units=fc1_units,
            fc2_units=fc2_units, action_size=action_size,
            block_batch=128, num_cores=1))
    assert jnp.allclose(out_tiled, ref_big, atol=1e-4, rtol=1e-4)

    print("KERNEL_OK")
</pallas_src>

<mosaic_0001>
module attributes {stable_mosaic.version = 11 : i64} {
  func.func @kernel(%arg0: i32, %arg1: memref<8x8xf32, #tpu.memory_space<vmem>>, %arg2: memref<288x128xf32, #tpu.memory_space<vmem>>, %arg3: memref<8x128xf32, #tpu.memory_space<vmem>>) attributes {dimension_semantics = [#tpu.dimension_semantics<parallel>], iteration_bounds = array<i64: 1>, scalar_prefetch = 0 : i64, scratch_operands = 0 : i64, tpu.core_type = #tpu.core_type<tc>, window_params = [{transform_indices = @transform_0, window_bounds = array<i64: 8, 8>}, {pipeline_mode = #tpu.pipeline_mode<synchronous>, transform_indices = @transform_1, window_bounds = array<i64: 288, 128>}, {transform_indices = @transform_2, window_bounds = array<i64: 8, 128>}]} {
    %c0 = arith.constant 0 : index
    %c0_0 = arith.constant 0 : index
    %0 = vector.load %arg1[%c0, %c0_0] : memref<8x8xf32, #tpu.memory_space<vmem>>, vector<8x8xf32>
    %c0_1 = arith.constant 0 : index
    %c0_2 = arith.constant 0 : index
    %1 = vector.load %arg2[%c0_1, %c0_2] : memref<288x128xf32, #tpu.memory_space<vmem>>, vector<8x128xf32>
    %c8 = arith.constant 8 : index
    %c0_3 = arith.constant 0 : index
    %2 = vector.load %arg2[%c8, %c0_3] : memref<288x128xf32, #tpu.memory_space<vmem>>, vector<1x128xf32>
    %cst = arith.constant dense<0.000000e+00> : vector<8x128xf32>
    %3 = tpu.matmul %0, %1, %cst {dimension_numbers = #tpu.dot_dimension_numbers<[1], [0], [0], [1], [0, 0, 1, 1], [], []>} : vector<8x8xf32>, vector<8x128xf32>, vector<8x128xf32> -> vector<8x128xf32>
    %4 = vector.broadcast %2 : vector<1x128xf32> to vector<8x128xf32>
    %5 = arith.addf %3, %4 : vector<8x128xf32>
    %cst_4 = arith.constant 0.000000e+00 : f32
    %6 = vector.broadcast %cst_4 : f32 to vector<8x128xf32>
    %7 = arith.maximumf %5, %6 : vector<8x128xf32>
    %c16 = arith.constant 16 : index
    %c0_5 = arith.constant 0 : index
    %8 = vector.load %arg2[%c16, %c0_5] : memref<288x128xf32, #tpu.memory_space<vmem>>, vector<128x128xf32>
    %c144 = arith.constant 144 : index
    %c0_6 = arith.constant 0 : index
    %9 = vector.load %arg2[%c144, %c0_6] : memref<288x128xf32, #tpu.memory_space<vmem>>, vector<1x128xf32>
    %cst_7 = arith.constant dense<0.000000e+00> : vector<8x128xf32>
    %10 = tpu.matmul %7, %8, %cst_7 {dimension_numbers = #tpu.dot_dimension_numbers<[1], [0], [0], [1], [0, 0, 1, 1], [], []>} : vector<8x128xf32>, vector<128x128xf32>, vector<8x128xf32> -> vector<8x128xf32>
    %11 = vector.broadcast %9 : vector<1x128xf32> to vector<8x128xf32>
    %12 = arith.addf %10, %11 : vector<8x128xf32>
    %cst_8 = arith.constant 0.000000e+00 : f32
    %13 = vector.broadcast %cst_8 : f32 to vector<8x128xf32>
    %14 = arith.maximumf %12, %13 : vector<8x128xf32>
    %c152 = arith.constant 152 : index
    %c0_9 = arith.constant 0 : index
    %15 = vector.load %arg2[%c152, %c0_9] : memref<288x128xf32, #tpu.memory_space<vmem>>, vector<128x128xf32>
    %c280 = arith.constant 280 : index
    %c0_10 = arith.constant 0 : index
    %16 = vector.load %arg2[%c280, %c0_10] : memref<288x128xf32, #tpu.memory_space<vmem>>, vector<1x128xf32>
    %cst_11 = arith.constant dense<0.000000e+00> : vector<8x128xf32>
    %17 = tpu.matmul %14, %15, %cst_11 {dimension_numbers = #tpu.dot_dimension_numbers<[1], [0], [0], [1], [0, 0, 1, 1], [], []>} : vector<8x128xf32>, vector<128x128xf32>, vector<8x128xf32> -> vector<8x128xf32>
    %18 = vector.broadcast %16 : vector<1x128xf32> to vector<8x128xf32>
    %19 = arith.addf %17, %18 : vector<8x128xf32>
    %c0_12 = arith.constant 0 : index
    %c0_13 = arith.constant 0 : index
    %20 = vector.load %arg3[%c0_12, %c0_13] : memref<8x128xf32, #tpu.memory_space<vmem>>, vector<8x128xf32>
    tpu.vector_store %arg3[%c0_12, %c0_13], %19 {strides = array<i32>} : memref<8x128xf32, #tpu.memory_space<vmem>>, vector<8x128xf32>,
    return
  }
  func.func @transform_0(%arg0: i32) -> (i32, i32) {
    %c0_i32 = arith.constant 0 : i32
    %c0_i32_0 = arith.constant 0 : i32
    return %arg0, %c0_i32 : i32, i32
  }
  func.func @transform_1(%arg0: i32) -> (i32, i32) {
    %c0_i32 = arith.constant 0 : i32
    %c0_i32_0 = arith.constant 0 : i32
    %c0_i32_1 = arith.constant 0 : i32
    return %c0_i32, %c0_i32_0 : i32, i32
  }
  func.func @transform_2(%arg0: i32) -> (i32, i32) {
    %c0_i32 = arith.constant 0 : i32
    %c0_i32_0 = arith.constant 0 : i32
    return %arg0, %c0_i32 : i32, i32
  }
}

</mosaic_0001>

<bundles_post_ra>
// kernel: qnetwork_forward_packed.1
= control target key start
LH: loop header
LB: loop body
LE: loop exit
PB: predicated region body
PF: predicated region fallthrough
CT: control target
= control target key end

     0   :  { %7 = vsyncpa [#allocation3], 0  ;;  %s172_s12 = smov [#allocation2]   ;;  %s173_s14 = smov 128   ;;  %s199_s0 = inlined_call_operand.vmem [shape: f32[8,8], index: 0, kind: input, shape index: {}]   ;;  %s200_s1 = inlined_call_operand.hbm [shape: f32[288,128], index: 1, kind: input, shape index: {}]   ;;  %s201_s2 = inlined_call_operand.vmem [shape: f32[8,128], index: 2, kind: output, shape index: {}]  }
   0x1   :  { %s14_s11 = sshll.u32 %s200_s1, 4  ;;  %s16_s13 = sshll.u32 %s172_s12, 4  ;;  %s15_s11 = int_to_ptr.hbm [resolvable:$true] %s14_s11  ;;  %s17_s13 = int_to_ptr.vmem [resolvable:$true] %s16_s13 }
   0x2   :  { %s174_s15 = smov 8  }
   0x3   :  { %22 = dma.hbm_to_vmem [thread:$0]  %s15_s11, 4608, %s17_s13, [#allocation3], %s173_s14, %s173_s14, %s174_s15  }
   0x4   :  { %170 = dma.done.wait [#allocation3], 4608  }
   0x5   :  { %171 = vsyncadd [#allocation3], 4294962688  ;;  %vm31_vm0 = vcmask 64512   ;;  %v28_v0 = vld [vmem:[#allocation2] sm:$0xff]  ;;  %v71_v2 = vld [vmem:[#allocation2 + $0x88] sm:$0xff] }
   0x6   :  { %v27_v1 = vld [vmem:[%s199_s0] sm:$0xff]  ;;  %50 = vmatpush.msra.mxu0 %v28_v0  ;;  %74 = vmatpush.msra.mxu1 %v71_v2  ;;  %v69_v4 = vld [vmem:[#allocation2 + $0x78] sm:$0xff]  ;;  %v68_v5 = vld [vmem:[#allocation2 + $0x70] sm:$0xff] }
   0x7   :  { %v70_v3 = vld [vmem:[#allocation2 + $0x80] sm:$0xff]  ;;  %139 = vmatmul.msk.f32.vlgmr.msra.gmra.mxu0 %vm31_vm0, %v27_v1  ;;  %v67_v6 = vld [vmem:[#allocation2 + $0x68] sm:$0xff]  ;;  %v65_v8 = vld [vmem:[#allocation2 + $0x58] sm:$0xff] }
   0x8   :  { %75 = vmatpush.msra.mxu1 %v70_v3  ;;  %v66_v7 = vld [vmem:[#allocation2 + $0x60] sm:$0xff]  ;;  %v64_v9 = vld [vmem:[#allocation2 + $0x50] sm:$0xff]  ;;  %v63_v10 = vld [vmem:[#allocation2 + $0x48] sm:$0xff] }
   0x9   :  { %v62_v11 = vld [vmem:[#allocation2 + $0x40] sm:$0xff]  ;;  %v61_v12 = vld [vmem:[#allocation2 + $0x38] sm:$0xff]  ;;  %v60_v13 = vld [vmem:[#allocation2 + $0x30] sm:$0xff] }
   0xa   :  { %76 = vmatpush.msra.mxu1 %v69_v4  ;;  %v59_v14 = vld [vmem:[#allocation2 + $0x28] sm:$0xff]  ;;  %v58_v15 = vld [vmem:[#allocation2 + $0x20] sm:$0xff]  ;;  %v57_v16 = vld [vmem:[#allocation2 + $0x18] sm:$0xff] }
   0xb   :  { %v56_v17 = vld [vmem:[#allocation2 + $0x10] sm:$0xff]  ;;  %v109_v19 = vld [vmem:[#allocation2 + $0x108] sm:$0xff]  ;;  %v108_v20 = vld [vmem:[#allocation2 + $0x100] sm:$0xff] }
   0xc   :  { %77 = vmatpush.msra.mxu1 %v68_v5  ;;  %v110_v18 = vld [vmem:[#allocation2 + $0x110] sm:$0xff]  ;;  %v107_v21 = vld [vmem:[#allocation2 + $0xf8] sm:$0xff]  ;;  %v105_v23 = vld [vmem:[#allocation2 + $0xe8] sm:$0xff] }
   0xd   :  { %113 = vmatpush.msra.mxu2 %v110_v18  ;;  %v106_v22 = vld [vmem:[#allocation2 + $0xf0] sm:$0xff]  ;;  %v104_v24 = vld [vmem:[#allocation2 + $0xe0] sm:$0xff]  ;;  %v103_v25 = vld [vmem:[#allocation2 + $0xd8] sm:$0xff] }
   0xe   :  { %78 = vmatpush.msra.mxu1 %v67_v6  ;;  %v102_v26 = vld [vmem:[#allocation2 + $0xd0] sm:$0xff]  ;;  %v101_v27 = vld [vmem:[#allocation2 + $0xc8] sm:$0xff]  ;;  %v100_v28 = vld [vmem:[#allocation2 + $0xc0] sm:$0xff] }
   0xf   :  { %114 = vmatpush.msra.mxu2 %v109_v19  ;;  %v99_v29 = vld [vmem:[#allocation2 + $0xb8] sm:$0xff]  ;;  %v98_v30 = vld [vmem:[#allocation2 + $0xb0] sm:$0xff]  ;;  %v143_v31 = vld [vmem:[#allocation2 + $0x8] ss:$0 sm:$0xff] }
  0x10   :  { %79 = vmatpush.msra.mxu1 %v66_v7  ;;  %v97_v35 = vld [vmem:[#allocation2 + $0xa8] sm:$0xff]  ;;  %v96_v36 = vld [vmem:[#allocation2 + $0xa0] sm:$0xff]  ;;  %v95_v37 = vld [vmem:[#allocation2 + $0x98] sm:$0xff] }
  0x11   :  { %115 = vmatpush.msra.mxu2 %v108_v20  ;;  %v144_v38 = vld [vmem:[#allocation2 + $0x90] ss:$0 sm:$0xff]  ;;  %v145_v42 = vld [vmem:[#allocation2 + $0x118] ss:$0 sm:$0xff] }
  0x12   :  { %80 = vmatpush.msra.mxu1 %v65_v8 }
  0x13   :  { %116 = vmatpush.msra.mxu2 %v107_v21 }
  0x14   :  { %81 = vmatpush.msra.mxu1 %v64_v9 }
  0x15   :  { %117 = vmatpush.msra.mxu2 %v106_v22 }
  0x16   :  { %82 = vmatpush.msra.mxu1 %v63_v10 }
  0x17   :  { %118 = vmatpush.msra.mxu2 %v105_v23 }
  0x18   :  { %83 = vmatpush.msra.mxu1 %v62_v11 }
  0x19   :  { %119 = vmatpush.msra.mxu2 %v104_v24 }
  0x1a   :  { %84 = vmatpush.msra.mxu1 %v61_v12 }
  0x1b   :  { %120 = vmatpush.msra.mxu2 %v103_v25 }
  0x1c   :  { %85 = vmatpush.msra.mxu1 %v60_v13 }
  0x1d   :  { %121 = vmatpush.msra.mxu2 %v102_v26 }
  0x1e   :  { %86 = vmatpush.msra.mxu1 %v59_v14 }
  0x1f   :  { %122 = vmatpush.msra.mxu2 %v101_v27 }
  0x20   :  { %87 = vmatpush.msra.mxu1 %v58_v15 }
  0x21   :  { %123 = vmatpush.msra.mxu2 %v100_v28 }
  0x22   :  { %88 = vmatpush.msra.mxu1 %v57_v16 }
  0x23   :  { %124 = vmatpush.msra.mxu2 %v99_v29 }
  0x24   :  { %89 = vmatpush.msra.mxu1 %v56_v17 }
  0x25   :  { %125 = vmatpush.msra.mxu2 %v98_v30 }
  0x27   :  { %126 = vmatpush.msra.mxu2 %v97_v35 }
  0x29   :  { %127 = vmatpush.msra.mxu2 %v96_v36 }
  0x2b   :  { %128 = vmatpush.msra.mxu2 %v95_v37 }
  0x84   :  { %v52_v32 = vpop.f32.mrf.mxu0 }
  0x85   :  { %v53_v33 = vadd.f32 %v143_v31, %v52_v32 }
  0x87   :  { %v55_v34 = vmax.f32 %v53_v33, 0.0 }
  0x89   :  { %90 = vmatmul.f32.vlgmr.msra.gmra.mxu1 %v55_v34 }
 0x106   :  { %v91_v39 = vpop.f32.mrf.mxu1 }
 0x107   :  { %v92_v40 = vadd.f32 %v144_v38, %v91_v39 }
 0x109   :  { %v94_v41 = vmax.f32 %v92_v40, 0.0 }
 0x10b   :  { %129 = vmatmul.f32.vlgmr.msra.gmra.mxu2 %v94_v41 }
 0x18e   :  { %v130_v43 = vpop.f32.mrf.mxu2 }
 0x18f   :  { %v131_v44 = vadd.f32 %v145_v42, %v130_v43 }
 0x191   :  { %133 = vst [vmem:[%s201_s2] sm:$0xff] %v131_v44 }
 0x192   :  { %138 = vsyncpa [#allocation3], 1 }

</bundles_post_ra>
